<compile_context>
chip_gen: v6e
topology: v6e:2x2x1
jax: 0.10.0
libtpu: 0.0.40
codegen_flags: <defaults>
</compile_context>

<pallas_src>
import functools

import jax
import jax.numpy as jnp
from jax.experimental import pallas as pl
from jax.experimental.pallas import tpu as pltpu


def _round_up(x, m):
    return ((x + m - 1) // m) * m


def _ff_kernel(x_ref, w1_ref, b1_ref, w2_ref, b2_ref, gamma_ref, beta_ref,
               o_ref, *, epsilon):
    # Activation tile [TM, C] in native dtype -> MXU directly, f32 accumulate.
    x = x_ref[...]

    # Linear 1 + ReLU  (bias/params already f32 from the wrapper)
    h = jnp.dot(x, w1_ref[...], preferred_element_type=jnp.float32)
    h = jnp.maximum(h + b1_ref[...], 0.0)

    # Linear 2 (feed the MXU in the weights' native dtype)
    y = jnp.dot(h.astype(w2_ref.dtype), w2_ref[...],
                preferred_element_type=jnp.float32)
    y = y + b2_ref[...]

    # Residual: outputs += inputs
    y = y + x.astype(jnp.float32)

    # layer_normalization: gamma * (y - mean) / (std + eps) + beta
    # torch.Tensor.std defaults to unbiased (ddof=1) -> divide by (C - 1);
    # eps is added to std (not to var), matching the PyTorch module.
    C = y.shape[-1]
    mean = jnp.mean(y, axis=-1, keepdims=True)
    centered = y - mean
    var_unbiased = jnp.sum(centered * centered, axis=-1, keepdims=True) / (C - 1)
    std = jnp.sqrt(var_unbiased)
    inv = pl.reciprocal(std + epsilon, approx=False)        # [TM, 1] per row
    out = gamma_ref[...] * (centered * inv) + beta_ref[...]
    o_ref[...] = out.astype(o_ref.dtype)


def feedforward_pallas(x, w1, b1, w2, b2, gamma, beta, epsilon=1e-8, tm=512):
    """x: [B, S, C]; w1: [C, H]; b1: [H]; w2: [H, C]; b2: [C]; gamma, beta: [C]."""
    B, S, C = x.shape
    H = w1.shape[1]
    M = B * S
    x2d = x.reshape(M, C)

    # Row tile: multiple of 8 sublanes, capped by (padded) M.  TM=512 keeps
    # VMEM comfortably inside 32 MiB scoped default headroom for typical C/H
    # while amortizing per-step overhead.
    tm = min(tm, _round_up(M, 8))
    m_pad = _round_up(M, tm)
    if m_pad != M:
        # Zero-pad extra rows; they produce finite garbage and are sliced off.
        x2d = jnp.pad(x2d, ((0, m_pad - M), (0, 0)))

    # Parameters that only enter the f32 epilogue/bias path: pre-cast to f32
    # once in the wrapper (avoids per-tile casts in the kernel).  Weights stay
    # in their native dtype for the MXU fast path.
    b1_2d = b1.reshape(1, H).astype(jnp.float32)
    b2_2d = b2.reshape(1, C).astype(jnp.float32)
    gamma_2d = gamma.reshape(1, C).astype(jnp.float32)
    beta_2d = beta.reshape(1, C).astype(jnp.float32)

    kernel = functools.partial(_ff_kernel, epsilon=epsilon)
    grid = (m_pad // tm,)

    out2d = pl.pallas_call(
        kernel,
        out_shape=jax.ShapeDtypeStruct((m_pad, C), x.dtype),
        grid=grid,
        in_specs=[
            pl.BlockSpec((tm, C), lambda i: (i, 0)),   # activation row tile
            pl.BlockSpec((C, H), lambda i: (0, 0)),    # w1 resident in VMEM
            pl.BlockSpec((1, H), lambda i: (0, 0)),    # b1
            pl.BlockSpec((H, C), lambda i: (0, 0)),    # w2 resident in VMEM
            pl.BlockSpec((1, C), lambda i: (0, 0)),    # b2
            pl.BlockSpec((1, C), lambda i: (0, 0)),    # gamma
            pl.BlockSpec((1, C), lambda i: (0, 0)),    # beta
        ],
        out_specs=pl.BlockSpec((tm, C), lambda i: (i, 0)),
        compiler_params=pltpu.CompilerParams(
            dimension_semantics=("parallel",),          # rows independent
            vmem_limit_bytes=48 * 1024 * 1024,          # safe on v5e/v6e/v7x
        ),
    )(x2d, w1, b1_2d, w2, b2_2d, gamma_2d, beta_2d)

    if m_pad != M:
        out2d = out2d[:M]
    return out2d.reshape(B, S, C)


def feedforward_ref(x, w1, b1, w2, b2, gamma, beta, epsilon=1e-8):
    """Pure-JAX reference mirroring the PyTorch forward (conv=False)."""
    h = jnp.maximum(jnp.dot(x, w1) + b1, 0.0)
    y = jnp.dot(h, w2) + b2
    y = y + x
    mean = jnp.mean(y, axis=-1, keepdims=True)
    std = jnp.sqrt(jnp.sum((y - mean) ** 2, axis=-1, keepdims=True)
                   / (y.shape[-1] - 1))
    return gamma * (y - mean) / (std + epsilon) + beta


if __name__ == "__main__":
    # Small shapes consistent with the module: the residual add requires
    # num_units[1] == in_channels.
    B, S = 2, 8
    in_channels = 32           # C
    num_units = [64, 32]       # [hidden H, C]

    key = jax.random.PRNGKey(0)
    k_x, k_w1, k_b1, k_w2, k_b2 = jax.random.split(key, 5)

    x = jax.random.normal(k_x, (B, S, in_channels), dtype=jnp.float32)

    # Deterministic synthetic parameters.
    w1 = jax.random.normal(k_w1, (in_channels, num_units[0]), jnp.float32) * 0.05
    b1 = jax.random.normal(k_b1, (num_units[0],), jnp.float32) * 0.05
    w2 = jax.random.normal(k_w2, (num_units[0], num_units[1]), jnp.float32) * 0.05
    b2 = jax.random.normal(k_b2, (num_units[1],), jnp.float32) * 0.05
    gamma = jnp.ones((in_channels,), jnp.float32)   # layer_normalization.gamma
    beta = jnp.zeros((in_channels,), jnp.float32)   # layer_normalization.beta

    out = feedforward_pallas(x, w1, b1, w2, b2, gamma, beta)
    out = jax.block_until_ready(out)

    ref = feedforward_ref(x, w1, b1, w2, b2, gamma, beta)
    assert out.shape == (B, S, in_channels)
    assert jnp.allclose(out, ref, atol=1e-5, rtol=1e-5), \
        f"max abs err {jnp.max(jnp.abs(out - ref))}"

    print("KERNEL_OK")
</pallas_src>

<mosaic_0001>
module attributes {stable_mosaic.version = 11 : i64} {
  func.func @_ff_kernel(%arg0: i32, %arg1: memref<16x32xf32, #tpu.memory_space<vmem>>, %arg2: memref<32x64xf32, #tpu.memory_space<vmem>>, %arg3: memref<1x64xf32, #tpu.memory_space<vmem>>, %arg4: memref<64x32xf32, #tpu.memory_space<vmem>>, %arg5: memref<1x32xf32, #tpu.memory_space<vmem>>, %arg6: memref<1x32xf32, #tpu.memory_space<vmem>>, %arg7: memref<1x32xf32, #tpu.memory_space<vmem>>, %arg8: memref<16x32xf32, #tpu.memory_space<vmem>>) attributes {dimension_semantics = [#tpu.dimension_semantics<parallel>], iteration_bounds = array<i64: 1>, scalar_prefetch = 0 : i64, scratch_operands = 0 : i64, tpu.core_type = #tpu.core_type<tc>, window_params = [{transform_indices = @transform_0, window_bounds = array<i64: 16, 32>}, {pipeline_mode = #tpu.pipeline_mode<synchronous>, transform_indices = @transform_1, window_bounds = array<i64: 32, 64>}, {pipeline_mode = #tpu.pipeline_mode<synchronous>, transform_indices = @transform_2, window_bounds = array<i64: 1, 64>}, {pipeline_mode = #tpu.pipeline_mode<synchronous>, transform_indices = @transform_3, window_bounds = array<i64: 64, 32>}, {pipeline_mode = #tpu.pipeline_mode<synchronous>, transform_indices = @transform_4, window_bounds = array<i64: 1, 32>}, {pipeline_mode = #tpu.pipeline_mode<synchronous>, transform_indices = @transform_5, window_bounds = array<i64: 1, 32>}, {pipeline_mode = #tpu.pipeline_mode<synchronous>, transform_indices = @transform_6, window_bounds = array<i64: 1, 32>}, {transform_indices = @transform_7, window_bounds = array<i64: 16, 32>}]} {
    %c0 = arith.constant 0 : index
    %c0_0 = arith.constant 0 : index
    %0 = vector.load %arg1[%c0, %c0_0] : memref<16x32xf32, #tpu.memory_space<vmem>>, vector<16x32xf32>
    %c0_1 = arith.constant 0 : index
    %c0_2 = arith.constant 0 : index
    %1 = vector.load %arg2[%c0_1, %c0_2] : memref<32x64xf32, #tpu.memory_space<vmem>>, vector<32x64xf32>
    %cst = arith.constant dense<0.000000e+00> : vector<16x64xf32>
    %2 = tpu.matmul %0, %1, %cst {dimension_numbers = #tpu.dot_dimension_numbers<[1], [0], [0], [1], [0, 0, 1, 1], [], []>} : vector<16x32xf32>, vector<32x64xf32>, vector<16x64xf32> -> vector<16x64xf32>
    %c0_3 = arith.constant 0 : index
    %c0_4 = arith.constant 0 : index
    %3 = vector.load %arg3[%c0_3, %c0_4] : memref<1x64xf32, #tpu.memory_space<vmem>>, vector<1x64xf32>
    %4 = vector.broadcast %3 : vector<1x64xf32> to vector<16x64xf32>
    %5 = arith.addf %2, %4 : vector<16x64xf32>
    %cst_5 = arith.constant 0.000000e+00 : f32
    %6 = vector.broadcast %cst_5 : f32 to vector<16x64xf32>
    %7 = arith.maximumf %5, %6 : vector<16x64xf32>
    %c0_6 = arith.constant 0 : index
    %c0_7 = arith.constant 0 : index
    %8 = vector.load %arg4[%c0_6, %c0_7] : memref<64x32xf32, #tpu.memory_space<vmem>>, vector<64x32xf32>
    %cst_8 = arith.constant dense<0.000000e+00> : vector<16x32xf32>
    %9 = tpu.matmul %7, %8, %cst_8 {dimension_numbers = #tpu.dot_dimension_numbers<[1], [0], [0], [1], [0, 0, 1, 1], [], []>} : vector<16x64xf32>, vector<64x32xf32>, vector<16x32xf32> -> vector<16x32xf32>
    %c0_9 = arith.constant 0 : index
    %c0_10 = arith.constant 0 : index
    %10 = vector.load %arg5[%c0_9, %c0_10] : memref<1x32xf32, #tpu.memory_space<vmem>>, vector<1x32xf32>
    %11 = vector.broadcast %10 : vector<1x32xf32> to vector<16x32xf32>
    %12 = arith.addf %9, %11 : vector<16x32xf32>
    %13 = arith.addf %12, %0 : vector<16x32xf32>
    %cst_11 = arith.constant dense<0.000000e+00> : vector<16xf32>
    %14 = vector.multi_reduction <add>, %13, %cst_11 [1] : vector<16x32xf32> to vector<16xf32>
    %15 = vector.shape_cast %14 : vector<16xf32> to vector<16x1xf32>
    %cst_12 = arith.constant 3.200000e+01 : f32
    %16 = vector.broadcast %cst_12 : f32 to vector<16x1xf32>
    %17 = arith.divf %15, %16 : vector<16x1xf32>
    %18 = vector.broadcast %17 : vector<16x1xf32> to vector<16x32xf32>
    %19 = arith.subf %13, %18 : vector<16x32xf32>
    %20 = arith.mulf %19, %19 : vector<16x32xf32>
    %cst_13 = arith.constant dense<0.000000e+00> : vector<16xf32>
    %21 = vector.multi_reduction <add>, %20, %cst_13 [1] : vector<16x32xf32> to vector<16xf32>
    %22 = vector.shape_cast %21 : vector<16xf32> to vector<16x1xf32>
    %cst_14 = arith.constant 3.100000e+01 : f32
    %23 = vector.broadcast %cst_14 : f32 to vector<16x1xf32>
    %24 = arith.divf %22, %23 : vector<16x1xf32>
    %25 = math.sqrt %24 : vector<16x1xf32>
    %cst_15 = arith.constant 9.99999993E-9 : f32
    %26 = vector.broadcast %cst_15 : f32 to vector<16x1xf32>
    %27 = arith.addf %25, %26 : vector<16x1xf32>
    %28 = tpu.reciprocal %27 : vector<16x1xf32> -> vector<16x1xf32>
    %c0_16 = arith.constant 0 : index
    %c0_17 = arith.constant 0 : index
    %29 = vector.load %arg6[%c0_16, %c0_17] : memref<1x32xf32, #tpu.memory_space<vmem>>, vector<1x32xf32>
    %30 = vector.broadcast %28 : vector<16x1xf32> to vector<16x32xf32>
    %31 = arith.mulf %19, %30 : vector<16x32xf32>
    %32 = vector.broadcast %29 : vector<1x32xf32> to vector<16x32xf32>
    %33 = arith.mulf %32, %31 : vector<16x32xf32>
    %c0_18 = arith.constant 0 : index
    %c0_19 = arith.constant 0 : index
    %34 = vector.load %arg7[%c0_18, %c0_19] : memref<1x32xf32, #tpu.memory_space<vmem>>, vector<1x32xf32>
    %35 = vector.broadcast %34 : vector<1x32xf32> to vector<16x32xf32>
    %36 = arith.addf %33, %35 : vector<16x32xf32>
    %c0_20 = arith.constant 0 : index
    %c0_21 = arith.constant 0 : index
    %37 = vector.load %arg8[%c0_20, %c0_21] : memref<16x32xf32, #tpu.memory_space<vmem>>, vector<16x32xf32>
    tpu.vector_store %arg8[%c0_20, %c0_21], %36 {strides = array<i32>} : memref<16x32xf32, #tpu.memory_space<vmem>>, vector<16x32xf32>,
    return
  }
  func.func @transform_0(%arg0: i32) -> (i32, i32) {
    %c0_i32 = arith.constant 0 : i32
    %c0_i32_0 = arith.constant 0 : i32
    return %arg0, %c0_i32 : i32, i32
  }
  func.func @transform_1(%arg0: i32) -> (i32, i32) {
    %c0_i32 = arith.constant 0 : i32
    %c0_i32_0 = arith.constant 0 : i32
    %c0_i32_1 = arith.constant 0 : i32
    return %c0_i32, %c0_i32_0 : i32, i32
  }
  func.func @transform_2(%arg0: i32) -> (i32, i32) {
    %c0_i32 = arith.constant 0 : i32
    %c0_i32_0 = arith.constant 0 : i32
    %c0_i32_1 = arith.constant 0 : i32
    return %c0_i32, %c0_i32_0 : i32, i32
  }
  func.func @transform_3(%arg0: i32) -> (i32, i32) {
    %c0_i32 = arith.constant 0 : i32
    %c0_i32_0 = arith.constant 0 : i32
    %c0_i32_1 = arith.constant 0 : i32
    return %c0_i32, %c0_i32_0 : i32, i32
  }
  func.func @transform_4(%arg0: i32) -> (i32, i32) {
    %c0_i32 = arith.constant 0 : i32
    %c0_i32_0 = arith.constant 0 : i32
    %c0_i32_1 = arith.constant 0 : i32
    return %c0_i32, %c0_i32_0 : i32, i32
  }
  func.func @transform_5(%arg0: i32) -> (i32, i32) {
    %c0_i32 = arith.constant 0 : i32
    %c0_i32_0 = arith.constant 0 : i32
    %c0_i32_1 = arith.constant 0 : i32
    return %c0_i32, %c0_i32_0 : i32, i32
  }
  func.func @transform_6(%arg0: i32) -> (i32, i32) {
    %c0_i32 = arith.constant 0 : i32
    %c0_i32_0 = arith.constant 0 : i32
    %c0_i32_1 = arith.constant 0 : i32
    return %c0_i32, %c0_i32_0 : i32, i32
  }
  func.func @transform_7(%arg0: i32) -> (i32, i32) {
    %c0_i32 = arith.constant 0 : i32
    %c0_i32_0 = arith.constant 0 : i32
    return %arg0, %c0_i32 : i32, i32
  }
}

</mosaic_0001>

<bundles_post_ra>
// kernel: tpu_custom_call.1
= control target key start
LH: loop header
LB: loop body
LE: loop exit
PB: predicated region body
PF: predicated region fallthrough
CT: control target
= control target key end

     0   :  { %vm40_vm0 = vcmask 261120   ;;  %s496_s0 = inlined_call_operand.vmem [shape: f32[16,32], index: 0, kind: input, shape index: {}]   ;;  %s497_s1 = inlined_call_operand.vmem [shape: f32[32,64], index: 1, kind: input, shape index: {}]   ;;  %s498_s2 = inlined_call_operand.vmem [shape: f32[1,64], index: 2, kind: input, shape index: {}]   ;;  %s499_s3 = inlined_call_operand.vmem [shape: f32[64,32], index: 3, kind: input, shape index: {}]   ;;  %s500_s4 = inlined_call_operand.vmem [shape: f32[1,32], index: 4, kind: input, shape index: {}]   ;;  %s501_s5 = inlined_call_operand.vmem [shape: f32[1,32], index: 5, kind: input, shape index: {}]   ;;  %s502_s6 = inlined_call_operand.vmem [shape: f32[1,32], index: 6, kind: input, shape index: {}]   ;;  %s503_s7 = inlined_call_operand.hbm [shape: f32[16,32], index: 7, kind: output, shape index: {}]  }
   0x1   :  { %v32_v0 = vld [vmem:[%s497_s1 + $0x18] sm:$0xff]  ;;  %v31_v1 = vld [vmem:[%s497_s1 + $0x10] sm:$0xff]  ;;  %v27_v2 = vld [vmem:[%s496_s0] sm:$0xff] }
   0x2   :  { %325 = vmatprep.subr.mxu0 %v32_v0  ;;  %v30_v3 = vld [vmem:[%s497_s1 + $0x8] sm:$0xff]  ;;  %333 = vmatprep.mubr.msk.f32.mxu0 %vm40_vm0, %v27_v2  ;;  %v131_v4 = vld [vmem:[%s499_s3 + $0x38] sm:$0xff]  ;;  %v130_v5 = vld [vmem:[%s499_s3 + $0x30] sm:$0xff] }
   0x3   :  { %326 = vmatpush3.msra.mxu0 %v32_v0  ;;  %336 = vmatprep.subr.mxu1 %v131_v4 }
   0x4   :  { %327 = vmatprep.subr.mxu0 %v31_v1 }
   0x5   :  { %12 = vsyncpa [#allocation3], 0  ;;  %328 = vmatpush3.msra.mxu0 %v31_v1  ;;  %v29_v6 = vld [vmem:[%s497_s1] sm:$0xff]  ;;  %337 = vmatpush3.msra.mxu1 %v131_v4  ;;  %v129_v7 = vld [vmem:[%s499_s3 + $0x28] sm:$0xff]  ;;  %vm139_vm1 = vcmask 523264   ;;  %s388_s9 = smov [#allocation2]  }
   0x6   :  { %329 = vmatprep.subr.mxu0 %v30_v3  ;;  %338 = vmatprep.subr.mxu1 %v130_v5  ;;  %v28_v8 = vld [vmem:[%s496_s0 + $0x8] sm:$0xff]  ;;  %v128_v9 = vld [vmem:[%s499_s3 + $0x20] sm:$0xff]  ;;  %v127_v10 = vld [vmem:[%s499_s3 + $0x18] sm:$0xff]  ;;  %s290_s10 = sshll.u32 %s388_s9, 4  ;;  %s291_s10 = int_to_ptr.vmem [resolvable:$true] %s290_s10 }
   0x7   :  { %330 = vmatpush3.msra.mxu0 %v30_v3  ;;  %339 = vmatpush3.msra.mxu1 %v130_v5  ;;  %v126_v11 = vld [vmem:[%s499_s3 + $0x10] sm:$0xff]  ;;  %v125_v12 = vld [vmem:[%s499_s3 + $0x8] sm:$0xff]  ;;  %v124_v13 = vld [vmem:[%s499_s3] sm:$0xff]  ;;  %s366_s11 = scalar_lea.vmem %s291_s10, 256  ;;  %p371_p1 = scmp.lt.s32.totalorder %s291_s10, %s291_s10 }
   0x8   :  { %331 = vmatprep.subr.mxu0 %v29_v6  ;;  %340 = vmatprep.subr.mxu1 %v129_v7  ;;  %v301_v14 = vld [vmem:[%s498_s2] ss:$0 sm:$0xff]  ;;  %p367_p0 = scmp.ne.s32.totalorder %s291_s10, %s366_s11  ;;  %p372_p2 = scmp.lt.s32.totalorder %s366_s11, %s366_s11 }
   0x9   :  { %332 = vmatpush3.msra.mxu0 %v29_v6  ;;  %341 = vmatpush3.msra.mxu1 %v129_v7  ;;  %v304_v22 = vld [vmem:[%s500_s4] ss:$0 sm:$0xff] }
   0xa   :  { %334 = vmatmul.mubr.msk.f32.vlgmr.msra.gmra.mxu0 %vm40_vm0, %v28_v8  ;;  %342 = vmatprep.subr.mxu1 %v128_v9  ;;  %v307_v57 = vld [vmem:[%s501_s5] ss:$0 sm:$0xff]  ;;  %p373_p3 = por %p372_p2, %p371_p1 }
   0xb   :  { %343 = vmatpush3.msra.mxu1 %v128_v9  ;;  %v308_v59 = vld [vmem:[%s502_s6] ss:$0 sm:$0xff] }
   0xc   :  { %344 = vmatprep.subr.mxu1 %v127_v10  ;;  %p374_p4 = pnand %p373_p3, %p367_p0 }
   0xd   :  { %345 = vmatpush3.msra.mxu1 %v127_v10 }
   0xe   :  { %346 = vmatprep.subr.mxu1 %v126_v11 }
   0xf   :  { %347 = vmatpush3.msra.mxu1 %v126_v11 }
  0x10   :  { %348 = vmatprep.subr.mxu1 %v125_v12 }
  0x11   :  { %349 = vmatpush3.msra.mxu1 %v125_v12 }
  0x12   :  { %350 = vmatprep.subr.mxu1 %v124_v13 }
  0x13   :  { %351 = vmatpush3.msra.mxu1 %v124_v13 }
  0xca   :  { %v335_v15 = vpop.f32.mrf.mxu0 }
  0xcb   :  { %v119_v16 = vadd.f32 %v335_v15, %v301_v14 }
  0xcc   :  { %v113_v17 = vpop.f32.mrf.mxu0 }
  0xcd   :  { %v114_v18 = vadd.f32 %v301_v14, %v113_v17  ;;  %v123_v20 = vmax.f32 %v119_v16, 0.0 }
  0xcf   :  { %v122_v19 = vmax.f32 %v114_v18, 0.0 }
  0xd1   :  { %352 = vmatprep.mubr.msk.f32.mxu1 %vm139_vm1, %v122_v19 }
  0xd2   :  { %353 = vmatmul.mubr.msk.f32.vlgmr.msra.gmra.mxu1 %vm139_vm1, %v123_v20 }
 0x192   :  { %v354_v21 = vpop.f32.mrf.mxu1 }
 0x193   :  { %v218_v24 = vadd.f32 %v354_v21, %v304_v22 }
 0x194   :  { %v212_v23 = vpop.f32.mrf.mxu1 }
 0x195   :  { %v213_v25 = vadd.f32 %v304_v22, %v212_v23  ;;  %v222_v28 = vadd.f32 %v218_v24, %v28_v8 }
 0x197   :  { %v221_v26 = vadd.f32 %v213_v25, %v27_v2  ;;  %v226_v29 = vsel %vm40_vm0, %v222_v28, 0.0 }
 0x199   :  { %v223_v27 = vsel %vm40_vm0, %v221_v26, 0.0 }
 0x19a   :  { %224 = vadd.xlane.f32.xlu0 %v223_v27 }
 0x19e   :  { %227 = vadd.xlane.f32.xlu0 %v226_v29 }
 0x223   :  { %v225_v30 = vpop.xlane.xlu0 %224 }
 0x224   :  { %v230_v31 = vmul.f32 0.03125, %v225_v30 }
 0x226   :  { %v232_v32 = vsub.f32 %v221_v26, %v230_v31 }
 0x227   :  { %v228_v33 = vpop.xlane.xlu0 %227 }
 0x228   :  { %v231_v34 = vmul.f32 0.03125, %v228_v33  ;;  %v234_v35 = vmul.f32 %v232_v32, %v232_v32 }
 0x22a   :  { %v233_v36 = vsub.f32 %v222_v28, %v231_v34  ;;  %v236_v37 = vsel %vm40_vm0, %v234_v35, 0.0 }
 0x22b   :  { %237 = vadd.xlane.f32.xlu1 %v236_v37 }
 0x22c   :  { %v235_v38 = vmul.f32 %v233_v36, %v233_v36 }
 0x22e   :  { %v239_v39 = vsel %vm40_vm0, %v235_v38, 0.0 }
 0x22f   :  { %240 = vadd.xlane.f32.xlu1 %v239_v39 }
 0x2b4   :  { %v238_v40 = vpop.xlane.xlu1 %237 }
 0x2b5   :  { %v243_v41 = vmul.f32 0.032258064, %v238_v40 }
 0x2b7   :  { %358 = vrsqrt.f32 %v243_v41  ;;  %vm247_vm2 = vcmp.eq.f32.partialorder %v243_v41, inf  ;;  %v250_v46 = vand.u32 2147483648, %v243_v41  ;;  %vm249_vm3 = vcmp.eq.f32.partialorder %v243_v41, 0.0 }
 0x2b8   :  { %v241_v42 = vpop.xlane.xlu1 %240 }
 0x2b9   :  { %v244_v43 = vmul.f32 0.032258064, %v241_v42 }
 0x2bb   :  { %360 = vrsqrt.f32 %v244_v43  ;;  %vm254_vm4 = vcmp.eq.f32.partialorder %v244_v43, inf  ;;  %v257_v52 = vand.u32 2147483648, %v244_v43  ;;  %vm256_vm5 = vcmp.eq.f32.partialorder %v244_v43, 0.0 }
 0x2c4   :  { %v359_v44 = vpop.eup %358 }
 0x2c5   :  { %v246_v45 = vmul.f32 %v359_v44, %v243_v41 }
 0x2c7   :  { %v248_v47 = vsel %vm247_vm2, %v243_v41, %v246_v45 }
 0x2c8   :  { %v361_v48 = vpop.eup %360  ;;  %v251_v49 = vsel %vm249_vm3, %v250_v46, %v248_v47 }
 0x2c9   :  { %v259_v50 = vadd.f32 1e-08, %v251_v49  ;;  %v253_v51 = vmul.f32 %v361_v48, %v244_v43 }
 0x2cb   :  { %362 = vrcp.f32 %v259_v50  ;;  %v255_v53 = vsel %vm254_vm4, %v244_v43, %v253_v51 }
 0x2cc   :  { %v258_v54 = vsel %vm256_vm5, %v257_v52, %v255_v53 }
 0x2cd   :  { %v260_v55 = vadd.f32 1e-08, %v258_v54 }
 0x2cf   :  { %364 = vrcp.f32 %v260_v55 }
 0x2d8   :  { %v363_v56 = vpop.eup %362 }
 0x2d9   :  { %v264_v58 = vmul.f32 %v363_v56, %v232_v32 }
 0x2db   :  { %v272_v60 = vmul.f32 %v307_v57, %v264_v58 }
 0x2dc   :  { %v365_v61 = vpop.eup %364 }
 0x2dd   :  { %v265_v62 = vmul.f32 %v365_v61, %v233_v36  ;;  %v281_v63 = vadd.f32 %v308_v59, %v272_v60 }
 0x2df   :  { %v273_v0 = vmul.f32 %v307_v57, %v265_v62  ;;  %283 = vst.msk [vmem:[#allocation2] sm:$0xff] %vm40_vm0, %v281_v63 }
 0x2e1   :  { %v282_v1 = vadd.f32 %v308_v59, %v273_v0 }
 0x2e3   :  { %284 = vst.msk [vmem:[#allocation2 + $0x8] sm:$0xff] %vm40_vm0, %v282_v1 }
 0x2e4   :  { %377 = shalt.err (!%p374_p4)
}
 0x2e5   :  { %s389_s5 = smov 128   ;;  %s390_s6 = smov 8  }
 0x2e6   :  { %296 = dma.vmem_to_hbm [thread:$0]  %s291_s10, 256, %s503_s7, [#allocation3], %s389_s5, %s389_s5, %s390_s6  }
 0x2e7   :  { %386 = dma.done.wait [#allocation3], 256  }
 0x2e8   :  { %387 = vsyncadd [#allocation3], 4294967040 }
 0x2e9   :  { %300 = vsyncpa [#allocation3], 1 }

</bundles_post_ra>
